<compile_context>
chip_gen: v6e
topology: v6e:2x2x1
jax: 0.10.0
libtpu: 0.0.40
codegen_flags: <defaults>
</compile_context>

<pallas_src>
import math

import jax
import jax.numpy as jnp
from jax import lax
from jax.experimental import pallas as pl
from jax.experimental.pallas import tpu as pltpu

QK_SIZE = 128
LANE = 128
# Explicit VMEM budget: above the 16/32 MiB scoped defaults, below v7x's
# 64 MiB physical VMEM (harmless on v5e/v6e's 128 MiB).
VMEM_LIMIT_BYTES = 48 * 1024 * 1024


def _round_up(n, m):
    return ((n + m - 1) // m) * m


def _pick_tile(s, max_tile):
    """Largest power-of-two tile <= max_tile dividing s (sublane-friendly)."""
    for t in (512, 256, 128, 64, 32, 16, 8):
        if t <= max_tile and t <= s and s % t == 0:
            return t
    return s  # small / odd S: use the full extent (legal full-dim block)


# --------------------------------------------------------------------------
# Kernel 1: fused Q/K/V projection (one wide matmul per sequence tile).
# --------------------------------------------------------------------------
def _qkv_proj_kernel(x_ref, w_ref, q_ref, k_ref, v_ref):
    # x_ref: (TS, inp_p)   w_ref: (inp_p, 2*128 + out_p)
    qkv = jnp.dot(x_ref[...], w_ref[...], preferred_element_type=jnp.float32)
    # Lane-aligned (multiple-of-128) slices of the fused result.
    q_ref[...] = qkv[:, :QK_SIZE].astype(q_ref.dtype)
    k_ref[...] = qkv[:, QK_SIZE:2 * QK_SIZE].astype(k_ref.dtype)
    v_ref[...] = qkv[:, 2 * QK_SIZE:].astype(v_ref.dtype)


# --------------------------------------------------------------------------
# Kernel 2: flash attention with online softmax.
# --------------------------------------------------------------------------
def _flash_attn_kernel(q_ref, k_ref, v_ref, o_ref, m_scr, l_scr):
    # q_ref: (TQ, 128)  k_ref: (TK, 128)  v_ref: (TK, out_p)  o_ref: (TQ, out_p) f32
    ki = pl.program_id(2)

    @pl.when(ki == 0)
    def _init():
        m_scr[...] = jnp.full(m_scr.shape, -jnp.inf, m_scr.dtype)
        l_scr[...] = jnp.zeros(l_scr.shape, l_scr.dtype)
        o_ref[...] = jnp.zeros(o_ref.shape, o_ref.dtype)

    # Scores: contract last dims directly (no explicit k transpose).
    # Scale 1/sqrt(128) is already folded into Wq.
    s = lax.dot_general(
        q_ref[...], k_ref[...],
        dimension_numbers=(((1,), (1,)), ((), ())),
        preferred_element_type=jnp.float32,
    )  # (TQ, TK)

    # Online softmax update; the f32 output block is the accumulator.
    m_prev = m_scr[...]
    m_new = jnp.maximum(m_prev, jnp.max(s, axis=-1, keepdims=True))
    alpha = jnp.exp(m_prev - m_new)
    p = jnp.exp(s - m_new)
    l_scr[...] = alpha * l_scr[...] + jnp.sum(p, axis=-1, keepdims=True)
    o_ref[...] = alpha * o_ref[...] + jnp.dot(
        p.astype(v_ref.dtype), v_ref[...], preferred_element_type=jnp.float32)
    m_scr[...] = m_new

    @pl.when(ki == pl.num_programs(2) - 1)
    def _finalize():
        inv_l = pl.reciprocal(l_scr[...], approx=True)  # EUP vrcp, ~free
        o_ref[...] = o_ref[...] * inv_l


# --------------------------------------------------------------------------
# Wrapper
# --------------------------------------------------------------------------
def att_forward(x, wq_t, wk_t, wv_t, *, max_tq=256, max_tk=256, max_tproj=256):
    """x: [B, S, inp]; w*_t: [inp, out] (pre-transposed vs. nn.Linear weights)."""
    B, S, inp = x.shape
    out_size = wv_t.shape[1]
    assert wq_t.shape == (inp, QK_SIZE) and wk_t.shape == (inp, QK_SIZE)
    dtype = x.dtype

    # Lane-dense feature dims: pad inp and out up to multiples of 128.
    inp_p = max(LANE, _round_up(inp, LANE))
    out_p = max(LANE, _round_up(out_size, LANE))

    if inp_p != inp:
        x = jnp.pad(x, ((0, 0), (0, 0), (0, inp_p - inp)))

    def _pad_w(w, rows, cols):
        wp = jnp.zeros((rows, cols), dtype)
        return wp.at[:w.shape[0], :w.shape[1]].set(w.astype(dtype))

    scale = 1.0 / math.sqrt(QK_SIZE)
    # Fused [Wq*scale | Wk | Wv_padded] weight, input dim zero-padded.
    w_fused = jnp.concatenate(
        [_pad_w(wq_t * scale, inp_p, QK_SIZE),
         _pad_w(wk_t, inp_p, QK_SIZE),
         _pad_w(wv_t, inp_p, out_p)], axis=1)  # (inp_p, 2*128 + out_p)
    w_cols = 2 * QK_SIZE + out_p

    # ---------------- projection pass (once per batch element) -------------
    ts = _pick_tile(S, max_tproj)
    # NOTE: the weight BlockSpec's index map is constant, so Pallas does not
    # re-DMA it per step; for very large weights, single-buffering it
    # (pipeline_mode=pl.Buffered(1)) or chunking inp would halve its VMEM.
    q, k, v = pl.pallas_call(
        _qkv_proj_kernel,
        out_shape=(
            jax.ShapeDtypeStruct((B, S, QK_SIZE), dtype),
            jax.ShapeDtypeStruct((B, S, QK_SIZE), dtype),
            jax.ShapeDtypeStruct((B, S, out_p), dtype),
        ),
        grid_spec=pltpu.PrefetchScalarGridSpec(
            num_scalar_prefetch=0,
            grid=(B, S // ts),
            in_specs=[
                pl.BlockSpec((None, ts, inp_p), lambda b, si: (b, si, 0)),
                pl.BlockSpec((inp_p, w_cols), lambda b, si: (0, 0)),
            ],
            out_specs=[
                pl.BlockSpec((None, ts, QK_SIZE), lambda b, si: (b, si, 0)),
                pl.BlockSpec((None, ts, QK_SIZE), lambda b, si: (b, si, 0)),
                pl.BlockSpec((None, ts, out_p), lambda b, si: (b, si, 0)),
            ],
        ),
        compiler_params=pltpu.CompilerParams(
            dimension_semantics=("parallel", "parallel"),
            vmem_limit_bytes=VMEM_LIMIT_BYTES,
        ),
    )(x, w_fused)

    # ---------------- flash attention pass ---------------------------------
    tq = _pick_tile(S, max_tq)
    tk = _pick_tile(S, max_tk)
    z_p = pl.pallas_call(
        _flash_attn_kernel,
        out_shape=jax.ShapeDtypeStruct((B, S, out_p), jnp.float32),
        grid_spec=pltpu.PrefetchScalarGridSpec(
            num_scalar_prefetch=0,
            grid=(B, S // tq, S // tk),
            in_specs=[
                pl.BlockSpec((None, tq, QK_SIZE), lambda b, qi, ki: (b, qi, 0)),
                pl.BlockSpec((None, tk, QK_SIZE), lambda b, qi, ki: (b, ki, 0)),
                pl.BlockSpec((None, tk, out_p), lambda b, qi, ki: (b, ki, 0)),
            ],
            out_specs=pl.BlockSpec((None, tq, out_p),
                                   lambda b, qi, ki: (b, qi, 0)),
            scratch_shapes=[
                pltpu.VMEM((tq, 1), jnp.float32),  # running max
                pltpu.VMEM((tq, 1), jnp.float32),  # running denominator
            ],
        ),
        compiler_params=pltpu.CompilerParams(
            dimension_semantics=("parallel", "parallel", "arbitrary"),
            vmem_limit_bytes=VMEM_LIMIT_BYTES,
        ),
    )(q, k, v)

    # Drop lane padding (only when it was added) and restore the input dtype.
    z = z_p if out_p == out_size else z_p[:, :, :out_size]
    return z.astype(dtype)


# --------------------------------------------------------------------------
# Reference + test
# --------------------------------------------------------------------------
def _init_linear_weight(key, out_features, in_features):
    # Deterministic init mimicking nn.Linear's kaiming-uniform bound.
    bound = 1.0 / math.sqrt(in_features)
    return jax.random.uniform(
        key, (out_features, in_features), jnp.float32, -bound, bound
    )  # (out, in), PyTorch convention


def att_reference(x, wq, wk, wv):
    q = jnp.einsum("bsi,oi->bso", x, wq)
    k = jnp.einsum("bsi,oi->bso", x, wk)
    v = jnp.einsum("bsi,oi->bso", x, wv)
    s = jnp.einsum("bqd,bkd->bqk", q, k) / math.sqrt(QK_SIZE)
    p = jax.nn.softmax(s, axis=2)
    return jnp.einsum("bqk,bkd->bqd", p, v)


if __name__ == "__main__":
    # Small shapes consistent with the module: batch=2, seq=8, inp=32, out=32.
    B, S, INP, OUT = 2, 8, 32, 32

    key = jax.random.PRNGKey(0)
    kx, kq, kk, kv = jax.random.split(key, 4)

    x = jax.random.normal(kx, (B, S, INP), jnp.float32)
    wq = _init_linear_weight(kq, QK_SIZE, INP)   # (128, inp)
    wk = _init_linear_weight(kk, QK_SIZE, INP)   # (128, inp)
    wv = _init_linear_weight(kv, OUT, INP)       # (out, inp)

    # Kernel takes transposed weights [in, out].
    z = att_forward(x, wq.T, wk.T, wv.T)
    z = jax.block_until_ready(z)

    z_ref = att_reference(x, wq, wk, wv)
    assert z.shape == z_ref.shape
    # Tolerance accounts for the approx (EUP) reciprocal in the epilogue.
    assert jnp.allclose(z, z_ref, atol=1e-3, rtol=1e-3), "mismatch vs reference"

    print("KERNEL_OK")
</pallas_src>

<mosaic_0001>
module attributes {stable_mosaic.version = 11 : i64} {
  func.func @_qkv_proj_kernel(%arg0: i32, %arg1: i32, %arg2: memref<1x8x128xf32, #tpu.memory_space<vmem>>, %arg3: memref<128x384xf32, #tpu.memory_space<vmem>>, %arg4: memref<1x8x128xf32, #tpu.memory_space<vmem>>, %arg5: memref<1x8x128xf32, #tpu.memory_space<vmem>>, %arg6: memref<1x8x128xf32, #tpu.memory_space<vmem>>) attributes {dimension_semantics = [#tpu.dimension_semantics<parallel>, #tpu.dimension_semantics<parallel>], iteration_bounds = array<i64: 2, 1>, scalar_prefetch = 0 : i64, scratch_operands = 0 : i64, tpu.core_type = #tpu.core_type<tc>, window_params = [{transform_indices = @transform_0, window_bounds = array<i64: 1, 8, 128>}, {pipeline_mode = #tpu.pipeline_mode<synchronous>, transform_indices = @transform_1, window_bounds = array<i64: 128, 384>}, {transform_indices = @transform_2, window_bounds = array<i64: 1, 8, 128>}, {transform_indices = @transform_3, window_bounds = array<i64: 1, 8, 128>}, {transform_indices = @transform_4, window_bounds = array<i64: 1, 8, 128>}]} {
    %c0 = arith.constant 0 : index
    %c0_0 = arith.constant 0 : index
    %c0_1 = arith.constant 0 : index
    %0 = vector.load %arg2[%c0, %c0_0, %c0_1] : memref<1x8x128xf32, #tpu.memory_space<vmem>>, vector<1x8x128xf32>
    %1 = vector.shape_cast %0 : vector<1x8x128xf32> to vector<8x128xf32>
    %c0_2 = arith.constant 0 : index
    %c0_3 = arith.constant 0 : index
    %2 = vector.load %arg3[%c0_2, %c0_3] : memref<128x384xf32, #tpu.memory_space<vmem>>, vector<128x384xf32>
    %cst = arith.constant dense<0.000000e+00> : vector<8x384xf32>
    %3 = tpu.matmul %1, %2, %cst {dimension_numbers = #tpu.dot_dimension_numbers<[1], [0], [0], [1], [0, 0, 1, 1], [], []>} : vector<8x128xf32>, vector<128x384xf32>, vector<8x384xf32> -> vector<8x384xf32>
    %4 = vector.extract_strided_slice %3 {offsets = [0, 0], sizes = [8, 128], strides = [1, 1]} : vector<8x384xf32> to vector<8x128xf32>
    %c0_4 = arith.constant 0 : index
    %c0_5 = arith.constant 0 : index
    %c0_6 = arith.constant 0 : index
    %5 = vector.load %arg4[%c0_4, %c0_5, %c0_6] : memref<1x8x128xf32, #tpu.memory_space<vmem>>, vector<1x8x128xf32>
    %6 = vector.shape_cast %5 : vector<1x8x128xf32> to vector<8x128xf32>
    %7 = vector.shape_cast %4 : vector<8x128xf32> to vector<1x8x128xf32>
    tpu.vector_store %arg4[%c0_4, %c0_5, %c0_6], %7 {strides = array<i32>} : memref<1x8x128xf32, #tpu.memory_space<vmem>>, vector<1x8x128xf32>,
    %8 = vector.extract_strided_slice %3 {offsets = [0, 128], sizes = [8, 128], strides = [1, 1]} : vector<8x384xf32> to vector<8x128xf32>
    %c0_7 = arith.constant 0 : index
    %c0_8 = arith.constant 0 : index
    %c0_9 = arith.constant 0 : index
    %9 = vector.load %arg5[%c0_7, %c0_8, %c0_9] : memref<1x8x128xf32, #tpu.memory_space<vmem>>, vector<1x8x128xf32>
    %10 = vector.shape_cast %9 : vector<1x8x128xf32> to vector<8x128xf32>
    %11 = vector.shape_cast %8 : vector<8x128xf32> to vector<1x8x128xf32>
    tpu.vector_store %arg5[%c0_7, %c0_8, %c0_9], %11 {strides = array<i32>} : memref<1x8x128xf32, #tpu.memory_space<vmem>>, vector<1x8x128xf32>,
    %12 = vector.extract_strided_slice %3 {offsets = [0, 256], sizes = [8, 128], strides = [1, 1]} : vector<8x384xf32> to vector<8x128xf32>
    %c0_10 = arith.constant 0 : index
    %c0_11 = arith.constant 0 : index
    %c0_12 = arith.constant 0 : index
    %13 = vector.load %arg6[%c0_10, %c0_11, %c0_12] : memref<1x8x128xf32, #tpu.memory_space<vmem>>, vector<1x8x128xf32>
    %14 = vector.shape_cast %13 : vector<1x8x128xf32> to vector<8x128xf32>
    %15 = vector.shape_cast %12 : vector<8x128xf32> to vector<1x8x128xf32>
    tpu.vector_store %arg6[%c0_10, %c0_11, %c0_12], %15 {strides = array<i32>} : memref<1x8x128xf32, #tpu.memory_space<vmem>>, vector<1x8x128xf32>,
    return
  }
  func.func @transform_0(%arg0: i32, %arg1: i32) -> (i32, i32, i32) {
    %c0_i32 = arith.constant 0 : i32
    %c0_i32_0 = arith.constant 0 : i32
    return %arg0, %arg1, %c0_i32 : i32, i32, i32
  }
  func.func @transform_1(%arg0: i32, %arg1: i32) -> (i32, i32) {
    %c0_i32 = arith.constant 0 : i32
    %c0_i32_0 = arith.constant 0 : i32
    %c0_i32_1 = arith.constant 0 : i32
    return %c0_i32, %c0_i32_0 : i32, i32
  }
  func.func @transform_2(%arg0: i32, %arg1: i32) -> (i32, i32, i32) {
    %c0_i32 = arith.constant 0 : i32
    %c0_i32_0 = arith.constant 0 : i32
    return %arg0, %arg1, %c0_i32 : i32, i32, i32
  }
  func.func @transform_3(%arg0: i32, %arg1: i32) -> (i32, i32, i32) {
    %c0_i32 = arith.constant 0 : i32
    %c0_i32_0 = arith.constant 0 : i32
    return %arg0, %arg1, %c0_i32 : i32, i32, i32
  }
  func.func @transform_4(%arg0: i32, %arg1: i32) -> (i32, i32, i32) {
    %c0_i32 = arith.constant 0 : i32
    %c0_i32_0 = arith.constant 0 : i32
    return %arg0, %arg1, %c0_i32 : i32, i32, i32
  }
}

</mosaic_0001>

<bundles_post_ra>
// kernel: tpu_custom_call.1
= control target key start
LH: loop header
LB: loop body
LE: loop exit
PB: predicated region body
PF: predicated region fallthrough
CT: control target
= control target key end

     0   :  { %s1326_s0 = inlined_call_operand.hbm [shape: f32[2,8,128], index: 0, kind: input, shape index: {}]   ;;  %s1327_s1 = inlined_call_operand.hbm [shape: f32[128,384], index: 1, kind: input, shape index: {}]   ;;  %s1328_s2 = inlined_call_operand.hbm [shape: f32[2,8,128], index: 2, kind: output, shape index: {0}]   ;;  %s1329_s3 = inlined_call_operand.hbm [shape: f32[2,8,128], index: 3, kind: output, shape index: {1}]   ;;  %s1330_s4 = inlined_call_operand.hbm [shape: f32[2,8,128], index: 4, kind: output, shape index: {2}]  }
   0x1   :  { %1334 = sst [smem:[#allocation15_spill]] %s1326_s0 }
   0x2   :  { %1335 = sst [smem:[#allocation16_spill]] %s1327_s1 }
   0x3   :  { %10 = vsyncpa [#allocation3], 0 }
   0x4   :  { %12 = vsyncpa [#allocation3 + $0x1], 0 }
   0x5   :  { %13 = vsyncpa [#allocation6], 0 }
   0x6   :  { %14 = vsyncpa [#allocation4], 0 }
   0x7   :  { %16 = vsyncpa [#allocation4 + $0x1], 0 }
   0x8   :  { %17 = vsyncpa [#allocation9], 0 }
   0x9   :  { %19 = vsyncpa [#allocation9 + $0x1], 0  ;;  %s1056_s15 = smov 0   ;;  %s1058_s16 = smov 0  }
   0xa   :  { %s1060_s17 = smov 0   ;;  %s1062_s18 = smov 0  }
   0xb   :  { %s1064_s19 = smov 0   ;;  %s1066_s20 = smov 0  }
   0xc LB: > { %s1087_s21 = sadd.s32 4294967295, %s1020_s20   ;;  %s1331_s22 = sadd.s32 4294967294, %s1020_s20   ;;  %s1020_s20 = sphi %s1066_s20, %s25_s20   ;;  %s1016_s19 = sphi %s1064_s19, %s1357_s19   ;;  %s1012_s18 = sphi %s1062_s18, %s1356_s18   ;;  %s1008_s17 = sphi %s1060_s17, %s1355_s17   ;;  %s1004_s16 = sphi %s1058_s16, %s1354_s16   ;;  %s1000_s15 = sphi %s1056_s15, %s1353_s15  }
   0xd   : > { %p59_p0 = scmp.ne.s32.totalorder %s1004_s16, %s1000_s15  ;;  %p1332_p1 = scmp.eq.s32.totalorder %s1087_s21, 0 }
   0xe   : > { %p112_p3 = scmp.eq.s32.totalorder %s1331_s22, 1  ;;  %p668_p5 = scmp.ge.s32.totalorder %s1020_s20, 1 }
   0xf   : > { %p1098_p4 = por %p1332_p1, %p59_p0  ;;  %p175_p7 = scmp.lt.s32.totalorder %s1020_s20, 3 }
  0x10   : > { %p1103_p6 = por %p112_p3, %p59_p0  ;;  %s1022_s26 = smov [#allocation5]  }
  0x11   : > { %p1108_p8 = pnand %p668_p5, %p175_p7  ;;  %s187_s27 = sshll.u32 %s1022_s26, 4  ;;  %s188_s27 = int_to_ptr.vmem [resolvable:$true] %s187_s27 }
  0x12   : > { %s1337_s24 = scalar_select %p1103_p6, 1, 0 }
  0x13   : > { %p751_p9 = pneg %p1108_p8  ;;  %s37_s29 = sadd.s32 1, %s1016_s19 }
  0x14   : > { %s837_s30 = scalar_lea.vmem %s188_s27, 6144  ;;  %p845_p5 = scmp.lt.s32.totalorder %s188_s27, %s188_s27 }
  0x15   : > { %p1117_p11 = pnand %p751_p9, %p1332_p1  ;;  %p838_p13 = scmp.ne.s32.totalorder %s188_s27, %s837_s30 }
  0x16   : > { %p846_p7 = scmp.lt.s32.totalorder %s837_s30, %s837_s30 }
  0x17   : > { %p828_p12 = pneg %p1117_p11 }
  0x18   : > { %p847_p2 = por %p846_p7, %p845_p5 }
  0x19   : > { %p840_p0 = pnand %p838_p13, %p828_p12 }
  0x1b   : > { %p841_p3 = pneg %p840_p0 }
  0x1d   : > { %p848_p6 = pnand %p847_p2, %p841_p3 }
  0x1f   : > { %851 = shalt.err (!%p848_p6)
}
  0x20   : > { %s1023_s5 = smov 384   ;;  %s1024_s6 = smov 24  }
  0x21   : > { %s1340_s1 = sld [smem:[#allocation16_spill]]  ;;  %p39_p2 = scmp.ge.s32.totalorder %s37_s29, 2 }
  0x22   : > { %s46_s9 = sadd.s32 1, %s1008_s17  ;;  %p53_p6 = scmp.ne.s32.totalorder %s1008_s17, %s1004_s16 }
  0x23   : > { %p54_p9 = scmp.eq.s32.totalorder %s1020_s20, 0  ;;  %s1359_s29 = smov (%p39_p2, %s37_s29), 0 }
  0x24   : > { %p1342_p13 = scmp.eq.s32.totalorder %s1087_s21, 1  ;;  %s41_s12 = ssub.s32 %s1016_s19, %s1359_s29 }
  0x25   : > { %p1135_p12 = por %p54_p9, %p53_p6  ;;  %p770_p3 = scmp.lt.s32.totalorder %s1020_s20, 2 }
  0x26   : > { %p1141_p0 = por %p1342_p13, %p53_p6  ;;  %s201_s13 = sand.u32 1, %s1008_s17  }
  0x27   : > { %754 = dma.hbm_to_vmem [thread:$0]  (!%p1117_p11), %s1340_s1, 6144, %s188_s27, [#allocation6], %s1023_s5, %s1023_s5, %s1024_s6  }
  0x28   : > { %p44_p11 = scmp.eq.s32.totalorder %s41_s12, 0  ;;  %s671_s14 = sshll.u32 %s201_s13, 3 }
  0x29   : > { %s672_s27 = sshll.u32 %s1016_s19, 7  ;;  %s1344_s0 = sld [smem:[#allocation15_spill]] }
  0x2a   : > { %s1150_s26 = scalar_select %p44_p11, %s1008_s17, %s46_s9  }
  0x2b   : > { %s205_s6 = scalar_lea.vmem [#allocation2], %s671_s14  ;;  %p1158_p5 = pnand %p770_p3, %p1135_p12 }
  0x2c   : > { %s213_s7 = sshll.u32 %s205_s6, 4  ;;  %s202_s22 = scalar_lea.sflag [#allocation3], %s201_s13  ;;  %s214_s7 = int_to_ptr.vmem [resolvable:$true] %s213_s7 }
  0x2d   : > { %p854_p7 = pneg %p1158_p5  ;;  %s865_s12 = scalar_lea.vmem %s214_s7, 128 }
  0x2e   : > { %p866_p2 = scmp.ne.s32.totalorder %s214_s7, %s865_s12  ;;  %s1025_s9 = smov [#allocation2]  }
  0x2f   : > { %s211_s5 = scalar_lea.hbm %s1344_s0, %s672_s27  ;;  %s870_s1 = sshll.u32 %s1025_s9, 4  ;;  %s871_s1 = int_to_ptr.vmem [resolvable:$false] %s870_s1 }
  0x30   : > { %p868_p6 = pnand %p866_p2, %p854_p7  ;;  %s872_s27 = scalar_lea.vmem %s871_s1, 256 }
  0x31   : > { %p873_p13 = scmp.lt.s32.totalorder %s214_s7, %s871_s1  ;;  %p874_p11 = scmp.lt.s32.totalorder %s872_s27, %s865_s12 }
  0x32   : > { %p869_p9 = pneg %p868_p6 }
  0x33   : > { %p875_p10 = por %p874_p11, %p873_p13 }
  0x35   : > { %p876_p1 = pnand %p875_p10, %p869_p9 }
  0x37   : > { %879 = shalt.err (!%p876_p1)
}
  0x38   : > { %758 = dma.hbm_to_vmem [thread:$0]  (!%p1158_p5), %s211_s5, 128, %s214_s7, %s202_s22  }
  0x39   : > { %222 = sbr.rel (%p1108_p8) target bundleno = 358 (0x166), region = 28  ;;  %s1169_s10 = sand.u32 (!%p1108_p8), 1, %s1004_s16  }
  0x3a   : > { %s1172_s13 = sshll.u32 (!%p1108_p8), %s1169_s10, 3  ;;  %s225_s1 = scalar_lea.sflag (!%p1108_p8), [#allocation3], %s1169_s10 }
  0x3b   : > { %s228_s14 = scalar_lea.vmem (!%p1108_p8), [#allocation2], %s1172_s13 }
  0x3e   : > { %983 = dma.done.wait (%p1098_p4), %s225_s1, 128  }
  0x3f   : > { %985 = vsyncadd (%p1098_p4), %s225_s1, 4294967168  ;;  %p1346_p1 = scmp.eq.s32.totalorder %s1087_s21, 0 }
  0x41   : > { %987 = dma.done.wait (%p1346_p1), [#allocation6], 6144   ;;  %p1347_p8 = pmov %p1346_p1 }
  0x42   : > { %v1026_v0 = vmov 0.0   ;;  %vm1027_vm0 = vmmov 0   ;;  %v314_v1 = vld [vmem:[#allocation5 + $0x170] sm:$0xff]  ;;  %v313_v2 = vld [vmem:[#allocation5 + $0x168] sm:$0xff]  ;;  %v311_v3 = vld [vmem:[#allocation5 + $0x158] sm:$0xff]  ;;  %s252_s22 = scalar_lea.vmem [#allocation7], %s1172_s13 }
  0x43   : > { %989 = vsyncadd (%p1347_p8), [#allocation6], 4294961152  ;;  %704 = vmatprep.subr.mxu1 %v1026_v0  ;;  %380 = vmatprep.mubr.f32.mxu0 %v1026_v0  ;;  %v315_v4 = vld [vmem:[#allocation5 + $0x178] sm:$0xff]  ;;  %v310_v5 = vld [vmem:[#allocation5 + $0x150] sm:$0xff]  ;;  %s485_s23 = sshll.u32 %s252_s22, 4  ;;  %s266_s25 = scalar_lea.vmem [#allocation10], %s1172_s13  ;;  %s1211_s23 = int_to_ptr.vmem [resolvable:$true] %s485_s23 }
  0x44   : > { %736 = vmatprep.mubr.msk.f32.mxu1 %vm1027_vm0, %v1026_v0  ;;  %316 = vmatprep.subr.mxu0 %v314_v1  ;;  %v308_v6 = vld [vmem:[#allocation5 + $0x140] sm:$0xff]  ;;  %v307_v8 = vld [vmem:[#allocation5 + $0x138] sm:$0xff]  ;;  %v309_v9 = vld [vmem:[#allocation5 + $0x148] sm:$0xff]  ;;  %s513_s28 = sshll.u32 %s266_s25, 4  ;;  %s682_s30 = sshll.u32 %s1012_s18, 7  ;;  %s1213_s28 = int_to_ptr.vmem [resolvable:$true] %s513_s28 }
  0x45   : > { %317 = vmatpush1.msra.mxu0 %v313_v2  ;;  %705 = vmatpush3.msra.mxu1 %v315_v4  ;;  %v312_v7 = vld [vmem:[#allocation5 + $0x160] sm:$0xff]  ;;  %v305_v10 = vld [vmem:[#allocation5 + $0x128] sm:$0xff]  ;;  %v306_v12 = vld [vmem:[#allocation5 + $0x130] sm:$0xff]  ;;  %s1333_s5 = scalar_lea.vmem [#allocation8], %s1172_s13  ;;  %s1218_s9 = scalar_lea.hbm %s1328_s2, %s682_s30 }
  0x46   : > { %318 = vmatprep.subr.mxu0 %v311_v3  ;;  %706 = vmatprep.subr.mxu1 %v1026_v0  ;;  %v304_v11 = vld [vmem:[#allocation5 + $0x120] sm:$0xff]  ;;  %v302_v13 = vld [vmem:[#allocation5 + $0x110] sm:$0xff]  ;;  %v301_v14 = vld [vmem:[#allocation5 + $0x108] sm:$0xff]  ;;  %s499_s6 = sshll.u32 %s1333_s5, 4  ;;  %s1225_s1 = scalar_lea.hbm %s1329_s3, %s682_s30  ;;  %s1220_s6 = int_to_ptr.vmem [resolvable:$true] %s499_s6 }
  0x47   : > { %319 = vmatpush1.msra.mxu0 %v310_v5  ;;  %707 = vmatpush3.msra.mxu1 %v312_v7  ;;  %v303_v15 = vld [vmem:[#allocation5 + $0x118] sm:$0xff]  ;;  %v298_v17 = vld [vmem:[#allocation5 + $0xf0] sm:$0xff]  ;;  %v300_v18 = vld [vmem:[#allocation5 + $0x100] sm:$0xff]  ;;  %s1230_s5 = scalar_lea.hbm %s1330_s4, %s682_s30  ;;  %s461_s8 = scalar_lea.sflag [#allocation4], %s1169_s10 }
  0x48   : > { %320 = vmatprep.subr.mxu0 %v308_v6  ;;  %708 = vmatprep.subr.mxu1 %v1026_v0  ;;  %v299_v16 = vld [vmem:[#allocation5 + $0xf8] sm:$0xff]  ;;  %v296_v19 = vld [vmem:[#allocation5 + $0xe0] sm:$0xff]  ;;  %v297_v21 = vld [vmem:[#allocation5 + $0xe8] sm:$0xff]  ;;  %s880_s12 = scalar_lea.vmem %s1211_s23, 128 }
  0x49   : > { %321 = vmatpush1.msra.mxu0 %v307_v8  ;;  %709 = vmatpush3.msra.mxu1 %v309_v9  ;;  %v295_v20 = vld [vmem:[#allocation5 + $0xd8] sm:$0xff]  ;;  %v293_v22 = vld [vmem:[#allocation5 + $0xc8] sm:$0xff]  ;;  %v292_v23 = vld [vmem:[#allocation5 + $0xc0] sm:$0xff]  ;;  %p881_p4 = scmp.ne.s32.totalorder %s1211_s23, %s880_s12 }
  0x4a   : > { %322 = vmatprep.subr.mxu0 %v305_v10  ;;  %710 = vmatprep.subr.mxu1 %v1026_v0  ;;  %v294_v24 = vld [vmem:[#allocation5 + $0xd0] sm:$0xff]  ;;  %v289_v26 = vld [vmem:[#allocation5 + $0xa8] sm:$0xff]  ;;  %v291_v27 = vld [vmem:[#allocation5 + $0xb8] sm:$0xff] }
  0x4b   : > { %323 = vmatpush1.msra.mxu0 %v304_v11  ;;  %711 = vmatpush3.msra.mxu1 %v306_v12  ;;  %v290_v25 = vld [vmem:[#allocation5 + $0xb0] sm:$0xff]  ;;  %v287_v28 = vld [vmem:[#allocation5 + $0x98] sm:$0xff]  ;;  %v288_v30 = vld [vmem:[#allocation5 + $0xa0] sm:$0xff]  ;;  %p882_p10 = pnand %p881_p4, %p1141_p0 }
  0x4c   : > { %324 = vmatprep.subr.mxu0 %v302_v13  ;;  %712 = vmatprep.subr.mxu1 %v1026_v0  ;;  %v286_v29 = vld [vmem:[#allocation5 + $0x90] sm:$0xff]  ;;  %v284_v31 = vld [vmem:[#allocation5 + $0x80] sm:$0xff]  ;;  %v283_v32 = vld [vmem:[#allocation5 + $0x78] sm:$0xff] }
  0x4d   : > { %325 = vmatpush1.msra.mxu0 %v301_v14  ;;  %713 = vmatpush3.msra.mxu1 %v303_v15  ;;  %v285_v33 = vld [vmem:[#allocation5 + $0x88] sm:$0xff]  ;;  %v280_v35 = vld [vmem:[#allocation5 + $0x60] sm:$0xff]  ;;  %v282_v36 = vld [vmem:[#allocation5 + $0x70] sm:$0xff]  ;;  %p883_p12 = pneg %p882_p10 }
  0x4e   : > { %326 = vmatprep.subr.mxu0 %v299_v16  ;;  %714 = vmatprep.subr.mxu1 %v1026_v0  ;;  %v281_v34 = vld [vmem:[#allocation5 + $0x68] sm:$0xff]  ;;  %v278_v37 = vld [vmem:[#allocation5 + $0x50] sm:$0xff]  ;;  %v279_v39 = vld [vmem:[#allocation5 + $0x58] sm:$0xff] }
  0x4f   : > { %327 = vmatpush1.msra.mxu0 %v298_v17  ;;  %715 = vmatpush3.msra.mxu1 %v300_v18  ;;  %v277_v38 = vld [vmem:[#allocation5 + $0x48] sm:$0xff]  ;;  %v275_v40 = vld [vmem:[#allocation5 + $0x38] sm:$0xff]  ;;  %v274_v41 = vld [vmem:[#allocation5 + $0x30] sm:$0xff] }
  0x50   : > { %328 = vmatprep.subr.mxu0 %v296_v19  ;;  %716 = vmatprep.subr.mxu1 %v1026_v0  ;;  %v276_v42 = vld [vmem:[#allocation5 + $0x40] sm:$0xff]  ;;  %v271_v44 = vld [vmem:[#allocation5 + $0x18] sm:$0xff]  ;;  %v273_v45 = vld [vmem:[#allocation5 + $0x28] sm:$0xff] }
  0x51   : > { %329 = vmatpush1.msra.mxu0 %v295_v20  ;;  %717 = vmatpush3.msra.mxu1 %v297_v21  ;;  %v272_v43 = vld [vmem:[#allocation5 + $0x20] sm:$0xff]  ;;  %v269_v46 = vld [vmem:[#allocation5 + $0x8] sm:$0xff]  ;;  %v270_v48 = vld [vmem:[#allocation5 + $0x10] sm:$0xff] }
  0x52   : > { %330 = vmatprep.subr.mxu0 %v293_v22  ;;  %718 = vmatprep.subr.mxu1 %v1026_v0  ;;  %v268_v47 = vld [vmem:[#allocation5] sm:$0xff]  ;;  %v267_v49 = vld [vmem:[%s228_s14] sm:$0xff] }
  0x53   : > { %331 = vmatpush1.msra.mxu0 %v292_v23  ;;  %719 = vmatpush3.msra.mxu1 %v294_v24 }
  0x54   : > { %332 = vmatprep.subr.mxu0 %v290_v25  ;;  %720 = vmatprep.subr.mxu1 %v1026_v0 }
  0x55   : > { %333 = vmatpush1.msra.mxu0 %v289_v26  ;;  %721 = vmatpush3.msra.mxu1 %v291_v27 }
  0x56   : > { %334 = vmatprep.subr.mxu0 %v287_v28  ;;  %722 = vmatprep.subr.mxu1 %v1026_v0 }
  0x57   : > { %335 = vmatpush1.msra.mxu0 %v286_v29  ;;  %723 = vmatpush3.msra.mxu1 %v288_v30 }
  0x58   : > { %336 = vmatprep.subr.mxu0 %v284_v31  ;;  %724 = vmatprep.subr.mxu1 %v1026_v0 }
  0x59   : > { %337 = vmatpush1.msra.mxu0 %v283_v32  ;;  %725 = vmatpush3.msra.mxu1 %v285_v33 }
  0x5a   : > { %338 = vmatprep.subr.mxu0 %v281_v34  ;;  %726 = vmatprep.subr.mxu1 %v1026_v0 }
  0x5b   : > { %339 = vmatpush1.msra.mxu0 %v280_v35  ;;  %727 = vmatpush3.msra.mxu1 %v282_v36 }
  0x5c   : > { %340 = vmatprep.subr.mxu0 %v278_v37  ;;  %728 = vmatprep.subr.mxu1 %v1026_v0 }
  0x5d   : > { %341 = vmatpush1.msra.mxu0 %v277_v38  ;;  %729 = vmatpush3.msra.mxu1 %v279_v39 }
  0x5e   : > { %342 = vmatprep.subr.mxu0 %v275_v40  ;;  %730 = vmatprep.subr.mxu1 %v1026_v0 }
  0x5f   : > { %343 = vmatpush1.msra.mxu0 %v274_v41  ;;  %731 = vmatpush3.msra.mxu1 %v276_v42 }
  0x60   : > { %344 = vmatprep.subr.mxu0 %v272_v43  ;;  %732 = vmatprep.subr.mxu1 %v1026_v0 }
  0x61   : > { %345 = vmatpush1.msra.mxu0 %v271_v44  ;;  %733 = vmatpush3.msra.mxu1 %v273_v45 }
  0x62   : > { %346 = vmatprep.subr.mxu0 %v269_v46  ;;  %734 = vmatprep.subr.mxu1 %v1026_v0 }
  0x63   : > { %347 = vmatpush1.msra.mxu0 %v268_v47  ;;  %735 = vmatpush3.msra.mxu1 %v270_v48 }
  0x64   : > { %381 = vmatmul.mubr.f32.vlgmr.msra.gmra.mxu0 %v267_v49  ;;  %737 = vmatmul.mubr.f32.vlgmr.msra.gmra.mxu1 %v267_v49 }
 0x124   : > { %v382_v50 = vpop.f32.mrf.mxu0  ;;  %v453_v51 = vpop.f32.mrf.mxu1 }
 0x125   : > { %457 = vst [vmem:[%s252_s22] sm:$0xff] %v382_v50  ;;  %459 = vst [vmem:[%s266_s25] sm:$0xff] %v453_v51  ;;  %s1028_s22 = smov [#allocation7]  }
 0x126   : > { %v384_v52 = vpop.f32.mrf.mxu0  ;;  %v738_v53 = vpop.f32.mrf.mxu1  ;;  %s884_s25 = sshll.u32 %s1028_s22, 4  ;;  %s885_s25 = int_to_ptr.vmem [resolvable:$false] %s884_s25 }
 0x127   : > { %s886_s0 = scalar_lea.vmem %s885_s25, 256  ;;  %p887_p3 = scmp.lt.s32.totalorder %s1211_s23, %s885_s25 }
 0x128   : > { %p888_p5 = scmp.lt.s32.totalorder %s886_s0, %s880_s12 }
 0x12a   : > { %p889_p7 = por %p888_p5, %p887_p3 }
 0x12c   : > { %p890_p2 = pnand %p889_p7, %p883_p12 }
 0x12e   : > { %893 = shalt.err (!%p890_p2)
}
 0x12f   : > { %s894_s30 = scalar_lea.hbm %s1218_s9, 128  ;;  %s898_s18 = scalar_lea.hbm %s1328_s2, 256 }
 0x130   : > { %p895_p6 = scmp.ne.s32.totalorder %s1218_s9, %s894_s30  ;;  %p899_p11 = scmp.lt.s32.totalorder %s1218_s9, %s1328_s2 }
 0x131   : > { %p900_p1 = scmp.lt.s32.totalorder %s898_s18, %s894_s30 }
 0x132   : > { %p896_p9 = pnand %p895_p6, %p1141_p0 }
 0x133   : > { %p901_p8 = por %p900_p1, %p899_p11 }
 0x134   : > { %p897_p13 = pneg %p896_p9 }
 0x136   : > { %p902_p4 = pnand %p901_p8, %p897_p13 }
 0x138   : > { %905 = shalt.err (!%p902_p4)
}
 0x139   : > { %745 = dma.vmem_to_hbm [thread:$0]  (%p1141_p0), %s1211_s23, 128, %s1218_s9, %s461_s8  }
 0x13a   : > { %s1348_s0 = scalar_lea.vmem [#allocation8], %s1172_s13  ;;  %s1349_s12 = sand.u32 1, %s1087_s21  }
 0x13b   : > { %458 = vst [vmem:[%s1348_s0] sm:$0xff] %v384_v52  ;;  %s1257_s22 = scalar_lea.sflag [#allocation9], %s1349_s12  ;;  %s906_s25 = scalar_lea.vmem %s1220_s6, 128 }
 0x13c   : > { %p907_p10 = scmp.ne.s32.totalorder %s1220_s6, %s906_s25  ;;  %s1029_s30 = smov [#allocation8]  }
 0x13d   : > { %s910_s10 = sshll.u32 %s1029_s30, 4  ;;  %s911_s10 = int_to_ptr.vmem [resolvable:$false] %s910_s10 }
 0x13e   : > { %p908_p12 = pnand %p907_p10, %p1141_p0  ;;  %s912_s7 = scalar_lea.vmem %s911_s10, 256 }
 0x13f   : > { %p913_p5 = scmp.lt.s32.totalorder %s1220_s6, %s911_s10  ;;  %p914_p7 = scmp.lt.s32.totalorder %s912_s7, %s906_s25 }
 0x140   : > { %p909_p3 = pneg %p908_p12 }
 0x141   : > { %p915_p2 = por %p914_p7, %p913_p5 }
 0x143   : > { %p916_p6 = pnand %p915_p2, %p909_p3 }
 0x145   : > { %919 = shalt.err (!%p916_p6)
}
 0x146   : > { %s920_s21 = scalar_lea.hbm %s1225_s1, 128  ;;  %s924_s9 = scalar_lea.hbm %s1329_s3, 256 }
 0x147   : > { %p921_p9 = scmp.ne.s32.totalorder %s1225_s1, %s920_s21  ;;  %p925_p1 = scmp.lt.s32.totalorder %s1225_s1, %s1329_s3 }
 0x148   : > { %p926_p8 = scmp.lt.s32.totalorder %s924_s9, %s920_s21 }
 0x149   : > { %p922_p13 = pnand %p921_p9, %p1141_p0 }
 0x14a   : > { %p927_p4 = por %p926_p8, %p925_p1 }
 0x14b   : > { %p923_p11 = pneg %p922_p13 }
 0x14d   : > { %p928_p10 = pnand %p927_p4, %p923_p11 }
 0x14f   : > { %931 = shalt.err (!%p928_p10)
}
 0x150   : > { %746 = dma.vmem_to_hbm [thread:$0]  (%p1141_p0), %s1220_s6, 128, %s1225_s1, %s1257_s22  }
 0x151   : > { %s932_s27 = scalar_lea.vmem %s1213_s28, 128  ;;  %s1030_s14 = smov [#allocation10]  }
 0x152   : > { %p933_p12 = scmp.ne.s32.totalorder %s1213_s28, %s932_s27  ;;  %s936_s0 = sshll.u32 %s1030_s14, 4  ;;  %s937_s0 = int_to_ptr.vmem [resolvable:$false] %s936_s0 }
 0x153   : > { %s938_s12 = scalar_lea.vmem %s937_s0, 256  ;;  %p939_p7 = scmp.lt.s32.totalorder %s1213_s28, %s937_s0 }
 0x154   : > { %p934_p3 = pnand %p933_p12, %p1141_p0  ;;  %p940_p2 = scmp.lt.s32.totalorder %s938_s12, %s932_s27 }
 0x156   : > { %p935_p5 = pneg %p934_p3  ;;  %p941_p6 = por %p940_p2, %p939_p7 }
 0x158   : > { %p942_p9 = pnand %p941_p6, %p935_p5 }
 0x15a   : > { %945 = shalt.err (!%p942_p9)
}
 0x15b   : > { %s946_s25 = scalar_lea.hbm %s1230_s5, 128  ;;  %s950_s30 = scalar_lea.hbm %s1330_s4, 256 }
 0x15c   : > { %p947_p13 = scmp.ne.s32.totalorder %s1230_s5, %s946_s25  ;;  %p951_p8 = scmp.lt.s32.totalorder %s1230_s5, %s1330_s4 }
 0x15d   : > { %p952_p4 = scmp.lt.s32.totalorder %s950_s30, %s946_s25 }
 0x15e   : > { %p948_p11 = pnand %p947_p13, %p1141_p0 }
 0x15f   : > { %p953_p10 = por %p952_p4, %p951_p8 }
 0x160   : > { %p949_p1 = pneg %p948_p11 }
 0x162   : > { %p954_p12 = pnand %p953_p10, %p949_p1 }
 0x164   : > { %957 = shalt.err (!%p954_p12)
}
 0x165   : > { %747 = dma.vmem_to_hbm [thread:$0]  (%p1141_p0), %s1213_s28, 128, %s1230_s5, %s1257_s22  }
 0x166 PF: > { %s525_s21 = sand.u32 1, %s1000_s15   ;;  %p1350_p3 = scmp.ne.s32.totalorder %s1337_s24, 0 }
 0x167   : > { %p1351_p5 = scmp.ge.s32.totalorder %s1020_s20, 2  ;;  %s526_s13 = scalar_lea.sflag [#allocation4], %s525_s21 }
 0x169   : > { %p760_p7 = pnand %p1351_p5, %p1350_p3 }
 0x16b   : > { %p761_p2 = pneg %p760_p7 }
 0x16d   : > { %991 = dma.done.wait (%p761_p2), %s526_s13, 128  }
 0x16e   : > { %993 = vsyncadd (%p761_p2), %s526_s13, 4294967168  ;;  %s1352_s23 = sadd.s32 4294967294, %s1020_s20  }
 0x16f   : > { %s534_s9 = sand.u32 1, %s1352_s23  }
 0x170   : > { %s535_s11 = scalar_lea.sflag [#allocation9], %s534_s9 }
 0x171   : > { %995 = dma.done.wait (%p761_p2), %s535_s11, 256  }
 0x172   : > { %997 = vsyncadd (%p761_p2), %s535_s11, 4294967040  ;;  %s25_s20 = sadd.s32 1, %s1020_s20   ;;  %s1353_s15 = smov %s1004_s16 }
 0x173   : > { %p22_p0 = scmp.ge.s32.totalorder %s25_s20, 4   ;;  %s1354_s16 = smov %s1008_s17 }
 0x174   : > { %s1355_s17 = smov %s1150_s26  ;;  %s1356_s18 = smov %s1016_s19 }
 0x175   : > { %s1357_s19 = smov %s1359_s29  ;;  %24 = sbr.rel (!%p22_p0) target bundleno = 12 (0xc), region = 109 }
 0x17a   :  { %549 = vsyncpa [#allocation3], 1 }
 0x17b   :  { %551 = vsyncpa [#allocation3 + $0x1], 1 }
 0x17c   :  { %552 = vsyncpa [#allocation6], 1 }
 0x17d   :  { %553 = vsyncpa [#allocation4], 1 }
 0x17e   :  { %555 = vsyncpa [#allocation4 + $0x1], 1 }
 0x17f   :  { %556 = vsyncpa [#allocation9], 1 }
 0x180   :  { %558 = vsyncpa [#allocation9 + $0x1], 1 }

</bundles_post_ra>
